<compile_context>
chip_gen: v5e
topology: v5e:2x2
jax: 0.10.0
libtpu: 0.0.40
codegen_flags: <defaults>
</compile_context>

<pallas_src>
import math

import jax
import jax.numpy as jnp
from jax.experimental import pallas as pl
from jax.experimental.pallas import tpu as pltpu  # noqa: F401  (TPU backend)

# ----------------------------- model config ---------------------------------
D_MODEL = 32
FFN_HIDDEN = 64
NUM_HEADS = 4
HEAD_DIM = D_MODEL // NUM_HEADS
SEQ = 8
BATCH = 2
LN_EPS = 1e-5

# Row layout of the packed small-operand slab, shape (8, 3*D_MODEL).
_ROW_BQKV, _ROW_BO, _ROW_G1, _ROW_BE1, _ROW_B1, _ROW_B2, _ROW_G2, _ROW_BE2 = range(8)


def _layer_norm(x, gamma, beta):
    # gamma/beta are (1, D); biased variance like the reference implementation.
    mean = jnp.mean(x, axis=-1, keepdims=True)
    var = jnp.mean(jnp.square(x - mean), axis=-1, keepdims=True)
    return gamma * (x - mean) * jax.lax.rsqrt(var + LN_EPS) + beta


def encoder_block_kernel(
    x_ref,     # (B, S, D)
    wqkv_ref,  # (D, 3D)   columns permuted to [q | k | v], head-major inside
    wo_ref,    # (D, D)    rows already in head-major (h, e) order (as in ref)
    w1_ref,    # (D, F)
    w2_ref,    # (F, D)
    vec_ref,   # (8, 3D)   packed bqkv / bo / g1 / be1 / b1 / b2 / g2 / be2
    o_ref,     # (B, S, D)
):
    f32 = jnp.float32
    x = x_ref[...]                                   # (B, S, D)
    B, S, D = x.shape
    H, HD = NUM_HEADS, HEAD_DIM
    F = w1_ref.shape[1]
    N = B * S

    vecs = vec_ref[...]                              # (8, 3D)
    bqkv = vecs[_ROW_BQKV:_ROW_BQKV + 1, :]          # (1, 3D)
    bo   = vecs[_ROW_BO:_ROW_BO + 1, 0:D]            # (1, D)
    g1   = vecs[_ROW_G1:_ROW_G1 + 1, 0:D]
    be1  = vecs[_ROW_BE1:_ROW_BE1 + 1, 0:D]
    b1   = vecs[_ROW_B1:_ROW_B1 + 1, 0:F]            # (1, F)
    b2   = vecs[_ROW_B2:_ROW_B2 + 1, 0:D]
    g2   = vecs[_ROW_G2:_ROW_G2 + 1, 0:D]
    be2  = vecs[_ROW_BE2:_ROW_BE2 + 1, 0:D]

    # ---------------- Multi-Head Attention ----------------
    x2 = x.reshape(N, D)                             # (B*S, D) — leading-dim merge

    # Fused QKV projection: one lane-dense matmul (N, D) @ (D, 3D).
    qkv = jnp.dot(x2, wqkv_ref[...], preferred_element_type=f32) + bqkv   # (N, 3D)
    qkv3 = qkv.reshape(B, S, 3 * D)                  # leading-dim split

    def heads(base):
        # Per-head lane slices stacked into a head-major batch dim m = h*B + b.
        return jnp.concatenate(
            [qkv3[:, :, base + h * HD: base + (h + 1) * HD] for h in range(H)],
            axis=0)                                  # (H*B, S, HD)

    q = heads(0)
    k = heads(D)
    v = heads(2 * D)

    scores = jnp.einsum('mqe,mke->mqk', q, k,
                        preferred_element_type=f32) * (1.0 / math.sqrt(HD))
    scores = scores - jnp.max(scores, axis=-1, keepdims=True)
    p = jnp.exp(scores)
    p = p * pl.reciprocal(jnp.sum(p, axis=-1, keepdims=True), approx=False)
    ctx = jnp.einsum('mqk,mke->mqe', p, v,
                     preferred_element_type=f32)     # (H*B, S, HD)

    # Lane-concat the heads back to (N, D) with column order (h, e), matching
    # the reference's transpose+reshape, then ONE output-projection matmul.
    ctx_flat = jnp.concatenate(
        [ctx[h * B:(h + 1) * B].reshape(N, HD) for h in range(H)], axis=-1)
    attn = jnp.dot(ctx_flat, wo_ref[...], preferred_element_type=f32) + bo

    # residual + norm1   (dropout1 == identity in eval)
    h1 = _layer_norm(attn + x2, g1, be1)             # (N, D)

    # ---------------- Feed-Forward Network ----------------
    ff = jnp.dot(h1, w1_ref[...], preferred_element_type=f32) + b1    # (N, F)
    ff = jnp.maximum(ff, 0.0)                        # ReLU
    ff = jnp.dot(ff, w2_ref[...], preferred_element_type=f32) + b2    # (N, D)

    # dropout2 == identity ; residual + norm2
    out = _layer_norm(ff + h1, g2, be2)
    o_ref[...] = out.reshape(B, S, D).astype(o_ref.dtype)


def _prep_operands(params):
    """Permute wqkv columns to [q | k | v] (head-major inside) and pack the
    eight small vectors into one (8, 3D) slab.  Done once, outside the kernel."""
    D, F, H, HD = D_MODEL, FFN_HIDDEN, NUM_HEADS, HEAD_DIM

    w3 = params["wqkv"].reshape(D, H, 3, HD)                     # (d, h, {q,k,v}, e)
    wqkv_p = jnp.concatenate(
        [w3[:, :, i, :].reshape(D, D) for i in range(3)], axis=1)  # (D, 3D)
    b3 = params["bqkv"].reshape(H, 3, HD)                        # (h, {q,k,v}, e)
    bqkv_p = jnp.concatenate([b3[:, i, :].reshape(D) for i in range(3)])  # (3D,)

    slab = jnp.zeros((8, 3 * D), jnp.float32)
    slab = slab.at[_ROW_BQKV, :].set(bqkv_p)
    slab = slab.at[_ROW_BO, :D].set(params["bo"][0])
    slab = slab.at[_ROW_G1, :D].set(params["g1"][0])
    slab = slab.at[_ROW_BE1, :D].set(params["be1"][0])
    slab = slab.at[_ROW_B1, :F].set(params["b1"][0])
    slab = slab.at[_ROW_B2, :D].set(params["b2"][0])
    slab = slab.at[_ROW_G2, :D].set(params["g2"][0])
    slab = slab.at[_ROW_BE2, :D].set(params["be2"][0])

    return wqkv_p, params["wo"], params["w1"], params["w2"], slab


def encoder_block(x, params):
    """x: (B, S, D) float32; params: dict of weights (see init_params)."""
    B, S, D = x.shape
    assert D == D_MODEL
    H, HD, F = NUM_HEADS, HEAD_DIM, FFN_HIDDEN
    N = B * S

    wqkv_p, wo, w1, w2, slab = _prep_operands(params)
    args = (x, wqkv_p, wo, w1, w2, slab)

    flops = (2 * N * D * 3 * D                 # fused QKV projection
             + 2 * 2 * (B * H) * S * S * HD    # scores + attention @ V
             + 2 * N * D * D                   # output projection
             + 2 * 2 * N * D * F)              # two FFN matmuls
    transcendentals = B * H * S * S + B * H * S + 2 * N    # exp + recip + rsqrt
    bytes_accessed = (sum(int(a.size) * a.dtype.itemsize for a in args)
                      + N * D * 4)

    return pl.pallas_call(
        encoder_block_kernel,
        out_shape=jax.ShapeDtypeStruct((B, S, D), jnp.float32),
        cost_estimate=pl.CostEstimate(
            flops=flops,
            transcendentals=transcendentals,
            bytes_accessed=bytes_accessed),
    )(*args)


def encoder_block_reference(x, params):
    """Pure-JAX reference mirroring the PyTorch module (eval mode)."""
    B, S, D = x.shape
    H, HD = NUM_HEADS, HEAD_DIM
    qkv = x @ params["wqkv"] + params["bqkv"][0]                  # (B,S,3D)
    qkv = jnp.transpose(qkv.reshape(B, S, H, 3 * HD), (0, 2, 1, 3))
    q, k, v = jnp.split(qkv, 3, axis=-1)                          # (B,H,S,dh)
    scores = jnp.einsum('bhqe,bhke->bhqk', q, k) / math.sqrt(HD)
    p = jax.nn.softmax(scores, axis=-1)
    vals = jnp.einsum('bhqk,bhke->bhqe', p, v)
    vals = jnp.transpose(vals, (0, 2, 1, 3)).reshape(B, S, D)
    attn = vals @ params["wo"] + params["bo"][0]

    def ln(t, g, b):
        m = jnp.mean(t, -1, keepdims=True)
        va = jnp.mean((t - m) ** 2, -1, keepdims=True)
        return g * (t - m) / jnp.sqrt(va + LN_EPS) + b

    h1 = ln(attn + x, params["g1"], params["be1"])
    ff = jnp.maximum(h1 @ params["w1"] + params["b1"][0], 0.0)
    ff = ff @ params["w2"] + params["b2"][0]
    return ln(ff + h1, params["g2"], params["be2"])


def init_params(key):
    ks = jax.random.split(key, 6)
    scale = 0.02
    return {
        # MultiHeadAttention: qkv_layer = Linear(D, 3D), linear_layer = Linear(D, D)
        "wqkv": scale * jax.random.normal(ks[0], (D_MODEL, 3 * D_MODEL), jnp.float32),
        "bqkv": jnp.zeros((1, 3 * D_MODEL), jnp.float32),
        "wo":   scale * jax.random.normal(ks[1], (D_MODEL, D_MODEL), jnp.float32),
        "bo":   jnp.zeros((1, D_MODEL), jnp.float32),
        # LayerNormalization 1
        "g1":   jnp.ones((1, D_MODEL), jnp.float32),
        "be1":  jnp.zeros((1, D_MODEL), jnp.float32),
        # FeedForwardNetwork: Linear(D, F) -> ReLU -> (dropout) -> Linear(F, D)
        "w1":   scale * jax.random.normal(ks[2], (D_MODEL, FFN_HIDDEN), jnp.float32),
        "b1":   jnp.zeros((1, FFN_HIDDEN), jnp.float32),
        "w2":   scale * jax.random.normal(ks[3], (FFN_HIDDEN, D_MODEL), jnp.float32),
        "b2":   jnp.zeros((1, D_MODEL), jnp.float32),
        # LayerNormalization 2
        "g2":   jnp.ones((1, D_MODEL), jnp.float32),
        "be2":  jnp.zeros((1, D_MODEL), jnp.float32),
    }


if __name__ == "__main__":
    key = jax.random.PRNGKey(0)
    kx, kp = jax.random.split(key)
    x = jax.random.normal(kx, (BATCH, SEQ, D_MODEL), jnp.float32)
    params = init_params(kp)

    out = jax.block_until_ready(encoder_block(x, params))

    assert out.shape == (BATCH, SEQ, D_MODEL)
    assert out.dtype == jnp.float32
    assert bool(jnp.all(jnp.isfinite(out)))

    ref = jax.block_until_ready(encoder_block_reference(x, params))
    max_err = float(jnp.max(jnp.abs(out - ref)))
    assert bool(jnp.allclose(out, ref, atol=2e-2, rtol=2e-2)), max_err

    print("KERNEL_OK")
</pallas_src>

<mosaic_0001>
module attributes {stable_mosaic.version = 11 : i64} {
  func.func @encoder_block_kernel(%arg0: memref<2x8x32xf32, #tpu.memory_space<vmem>>, %arg1: memref<32x96xf32, #tpu.memory_space<vmem>>, %arg2: memref<32x32xf32, #tpu.memory_space<vmem>>, %arg3: memref<32x64xf32, #tpu.memory_space<vmem>>, %arg4: memref<64x32xf32, #tpu.memory_space<vmem>>, %arg5: memref<8x96xf32, #tpu.memory_space<vmem>>, %arg6: memref<2x8x32xf32, #tpu.memory_space<vmem>>) attributes {dimension_semantics = [], scalar_prefetch = 0 : i64, scratch_operands = 0 : i64, tpu.core_type = #tpu.core_type<tc>} {
    %c0 = arith.constant 0 : index
    %c0_0 = arith.constant 0 : index
    %c0_1 = arith.constant 0 : index
    %0 = vector.load %arg0[%c0, %c0_0, %c0_1] : memref<2x8x32xf32, #tpu.memory_space<vmem>>, vector<2x8x32xf32>
    %c0_2 = arith.constant 0 : index
    %c0_3 = arith.constant 0 : index
    %1 = vector.load %arg5[%c0_2, %c0_3] : memref<8x96xf32, #tpu.memory_space<vmem>>, vector<8x96xf32>
    %2 = vector.extract_strided_slice %1 {offsets = [0, 0], sizes = [1, 96], strides = [1, 1]} : vector<8x96xf32> to vector<1x96xf32>
    %3 = vector.extract_strided_slice %1 {offsets = [1, 0], sizes = [1, 32], strides = [1, 1]} : vector<8x96xf32> to vector<1x32xf32>
    %4 = vector.extract_strided_slice %1 {offsets = [2, 0], sizes = [1, 32], strides = [1, 1]} : vector<8x96xf32> to vector<1x32xf32>
    %5 = vector.extract_strided_slice %1 {offsets = [3, 0], sizes = [1, 32], strides = [1, 1]} : vector<8x96xf32> to vector<1x32xf32>
    %6 = vector.extract_strided_slice %1 {offsets = [4, 0], sizes = [1, 64], strides = [1, 1]} : vector<8x96xf32> to vector<1x64xf32>
    %7 = vector.extract_strided_slice %1 {offsets = [5, 0], sizes = [1, 32], strides = [1, 1]} : vector<8x96xf32> to vector<1x32xf32>
    %8 = vector.extract_strided_slice %1 {offsets = [6, 0], sizes = [1, 32], strides = [1, 1]} : vector<8x96xf32> to vector<1x32xf32>
    %9 = vector.extract_strided_slice %1 {offsets = [7, 0], sizes = [1, 32], strides = [1, 1]} : vector<8x96xf32> to vector<1x32xf32>
    %10 = vector.shape_cast %0 : vector<2x8x32xf32> to vector<16x32xf32>
    %c0_4 = arith.constant 0 : index
    %c0_5 = arith.constant 0 : index
    %11 = vector.load %arg1[%c0_4, %c0_5] : memref<32x96xf32, #tpu.memory_space<vmem>>, vector<32x96xf32>
    %cst = arith.constant dense<0.000000e+00> : vector<16x96xf32>
    %12 = tpu.matmul %10, %11, %cst {dimension_numbers = #tpu.dot_dimension_numbers<[1], [0], [0], [1], [0, 0, 1, 1], [], []>} : vector<16x32xf32>, vector<32x96xf32>, vector<16x96xf32> -> vector<16x96xf32>
    %13 = vector.broadcast %2 : vector<1x96xf32> to vector<16x96xf32>
    %14 = arith.addf %12, %13 : vector<16x96xf32>
    %15 = vector.shape_cast %14 : vector<16x96xf32> to vector<2x8x96xf32>
    %16 = vector.extract_strided_slice %15 {offsets = [0, 0, 0], sizes = [2, 8, 8], strides = [1, 1, 1]} : vector<2x8x96xf32> to vector<2x8x8xf32>
    %17 = vector.extract_strided_slice %15 {offsets = [0, 0, 8], sizes = [2, 8, 8], strides = [1, 1, 1]} : vector<2x8x96xf32> to vector<2x8x8xf32>
    %18 = vector.extract_strided_slice %15 {offsets = [0, 0, 16], sizes = [2, 8, 8], strides = [1, 1, 1]} : vector<2x8x96xf32> to vector<2x8x8xf32>
    %19 = vector.extract_strided_slice %15 {offsets = [0, 0, 24], sizes = [2, 8, 8], strides = [1, 1, 1]} : vector<2x8x96xf32> to vector<2x8x8xf32>
    %20 = tpu.concatenate %16, %17, %18, %19 in 0 : vector<2x8x8xf32>, vector<2x8x8xf32>, vector<2x8x8xf32>, vector<2x8x8xf32> -> vector<8x8x8xf32>
    %21 = vector.extract_strided_slice %15 {offsets = [0, 0, 32], sizes = [2, 8, 8], strides = [1, 1, 1]} : vector<2x8x96xf32> to vector<2x8x8xf32>
    %22 = vector.extract_strided_slice %15 {offsets = [0, 0, 40], sizes = [2, 8, 8], strides = [1, 1, 1]} : vector<2x8x96xf32> to vector<2x8x8xf32>
    %23 = vector.extract_strided_slice %15 {offsets = [0, 0, 48], sizes = [2, 8, 8], strides = [1, 1, 1]} : vector<2x8x96xf32> to vector<2x8x8xf32>
    %24 = vector.extract_strided_slice %15 {offsets = [0, 0, 56], sizes = [2, 8, 8], strides = [1, 1, 1]} : vector<2x8x96xf32> to vector<2x8x8xf32>
    %25 = tpu.concatenate %21, %22, %23, %24 in 0 : vector<2x8x8xf32>, vector<2x8x8xf32>, vector<2x8x8xf32>, vector<2x8x8xf32> -> vector<8x8x8xf32>
    %26 = vector.extract_strided_slice %15 {offsets = [0, 0, 64], sizes = [2, 8, 8], strides = [1, 1, 1]} : vector<2x8x96xf32> to vector<2x8x8xf32>
    %27 = vector.extract_strided_slice %15 {offsets = [0, 0, 72], sizes = [2, 8, 8], strides = [1, 1, 1]} : vector<2x8x96xf32> to vector<2x8x8xf32>
    %28 = vector.extract_strided_slice %15 {offsets = [0, 0, 80], sizes = [2, 8, 8], strides = [1, 1, 1]} : vector<2x8x96xf32> to vector<2x8x8xf32>
    %29 = vector.extract_strided_slice %15 {offsets = [0, 0, 88], sizes = [2, 8, 8], strides = [1, 1, 1]} : vector<2x8x96xf32> to vector<2x8x8xf32>
    %30 = tpu.concatenate %26, %27, %28, %29 in 0 : vector<2x8x8xf32>, vector<2x8x8xf32>, vector<2x8x8xf32>, vector<2x8x8xf32> -> vector<8x8x8xf32>
    "tpu.trace_start"() <{level = 10 : i32, message = "mqe,mke->mqk"}> : () -> ()
    %cst_6 = arith.constant dense<0.000000e+00> : vector<8x8x8xf32>
    %31 = tpu.matmul %20, %25, %cst_6 {dimension_numbers = #tpu.dot_dimension_numbers<[2], [2], [1], [1], [0, 0, 0, 1, 1, 1], [0], [0]>} : vector<8x8x8xf32>, vector<8x8x8xf32>, vector<8x8x8xf32> -> vector<8x8x8xf32>
    "tpu.trace_stop"() : () -> ()
    %cst_7 = arith.constant 0.353553385 : f32
    %32 = vector.broadcast %cst_7 : f32 to vector<8x8x8xf32>
    %33 = arith.mulf %31, %32 : vector<8x8x8xf32>
    %cst_8 = arith.constant dense<0xFF800000> : vector<8x8xf32>
    %34 = vector.multi_reduction <maximumf>, %33, %cst_8 [2] : vector<8x8x8xf32> to vector<8x8xf32>
    %35 = vector.shape_cast %34 : vector<8x8xf32> to vector<8x8x1xf32>
    %36 = vector.broadcast %35 : vector<8x8x1xf32> to vector<8x8x8xf32>
    %37 = arith.subf %33, %36 : vector<8x8x8xf32>
    %38 = math.exp %37 : vector<8x8x8xf32>
    %cst_9 = arith.constant dense<0.000000e+00> : vector<8x8xf32>
    %39 = vector.multi_reduction <add>, %38, %cst_9 [2] : vector<8x8x8xf32> to vector<8x8xf32>
    %40 = vector.shape_cast %39 : vector<8x8xf32> to vector<8x8x1xf32>
    %41 = tpu.reciprocal %40 : vector<8x8x1xf32> -> vector<8x8x1xf32>
    %42 = vector.broadcast %41 : vector<8x8x1xf32> to vector<8x8x8xf32>
    %43 = arith.mulf %38, %42 : vector<8x8x8xf32>
    "tpu.trace_start"() <{level = 10 : i32, message = "mqk,mke->mqe"}> : () -> ()
    %cst_10 = arith.constant dense<0.000000e+00> : vector<8x8x8xf32>
    %44 = tpu.matmul %43, %30, %cst_10 {dimension_numbers = #tpu.dot_dimension_numbers<[2], [1], [1], [2], [0, 0, 0, 1, 1, 2], [0], [0]>} : vector<8x8x8xf32>, vector<8x8x8xf32>, vector<8x8x8xf32> -> vector<8x8x8xf32>
    "tpu.trace_stop"() : () -> ()
    %45 = vector.extract_strided_slice %44 {offsets = [0, 0, 0], sizes = [2, 8, 8], strides = [1, 1, 1]} : vector<8x8x8xf32> to vector<2x8x8xf32>
    %46 = vector.shape_cast %45 : vector<2x8x8xf32> to vector<16x8xf32>
    %47 = vector.extract_strided_slice %44 {offsets = [2, 0, 0], sizes = [2, 8, 8], strides = [1, 1, 1]} : vector<8x8x8xf32> to vector<2x8x8xf32>
    %48 = vector.shape_cast %47 : vector<2x8x8xf32> to vector<16x8xf32>
    %49 = vector.extract_strided_slice %44 {offsets = [4, 0, 0], sizes = [2, 8, 8], strides = [1, 1, 1]} : vector<8x8x8xf32> to vector<2x8x8xf32>
    %50 = vector.shape_cast %49 : vector<2x8x8xf32> to vector<16x8xf32>
    %51 = vector.extract_strided_slice %44 {offsets = [6, 0, 0], sizes = [2, 8, 8], strides = [1, 1, 1]} : vector<8x8x8xf32> to vector<2x8x8xf32>
    %52 = vector.shape_cast %51 : vector<2x8x8xf32> to vector<16x8xf32>
    %53 = tpu.concatenate %46, %48, %50, %52 in 1 : vector<16x8xf32>, vector<16x8xf32>, vector<16x8xf32>, vector<16x8xf32> -> vector<16x32xf32>
    %c0_11 = arith.constant 0 : index
    %c0_12 = arith.constant 0 : index
    %54 = vector.load %arg2[%c0_11, %c0_12] : memref<32x32xf32, #tpu.memory_space<vmem>>, vector<32x32xf32>
    %cst_13 = arith.constant dense<0.000000e+00> : vector<16x32xf32>
    %55 = tpu.matmul %53, %54, %cst_13 {dimension_numbers = #tpu.dot_dimension_numbers<[1], [0], [0], [1], [0, 0, 1, 1], [], []>} : vector<16x32xf32>, vector<32x32xf32>, vector<16x32xf32> -> vector<16x32xf32>
    %56 = vector.broadcast %3 : vector<1x32xf32> to vector<16x32xf32>
    %57 = arith.addf %55, %56 : vector<16x32xf32>
    %58 = arith.addf %57, %10 : vector<16x32xf32>
    %cst_14 = arith.constant dense<0.000000e+00> : vector<16xf32>
    %59 = vector.multi_reduction <add>, %58, %cst_14 [1] : vector<16x32xf32> to vector<16xf32>
    %60 = vector.shape_cast %59 : vector<16xf32> to vector<16x1xf32>
    %cst_15 = arith.constant 3.200000e+01 : f32
    %61 = vector.broadcast %cst_15 : f32 to vector<16x1xf32>
    %62 = arith.divf %60, %61 : vector<16x1xf32>
    %63 = vector.broadcast %62 : vector<16x1xf32> to vector<16x32xf32>
    %64 = arith.subf %58, %63 : vector<16x32xf32>
    %65 = arith.mulf %64, %64 : vector<16x32xf32>
    %cst_16 = arith.constant dense<0.000000e+00> : vector<16xf32>
    %66 = vector.multi_reduction <add>, %65, %cst_16 [1] : vector<16x32xf32> to vector<16xf32>
    %67 = vector.shape_cast %66 : vector<16xf32> to vector<16x1xf32>
    %cst_17 = arith.constant 3.200000e+01 : f32
    %68 = vector.broadcast %cst_17 : f32 to vector<16x1xf32>
    %69 = arith.divf %67, %68 : vector<16x1xf32>
    %70 = vector.broadcast %62 : vector<16x1xf32> to vector<16x32xf32>
    %71 = arith.subf %58, %70 : vector<16x32xf32>
    %72 = vector.broadcast %4 : vector<1x32xf32> to vector<16x32xf32>
    %73 = arith.mulf %72, %71 : vector<16x32xf32>
    %cst_18 = arith.constant 9.99999974E-6 : f32
    %74 = vector.broadcast %cst_18 : f32 to vector<16x1xf32>
    %75 = arith.addf %69, %74 : vector<16x1xf32>
    %76 = math.rsqrt %75 : vector<16x1xf32>
    %77 = vector.broadcast %76 : vector<16x1xf32> to vector<16x32xf32>
    %78 = arith.mulf %73, %77 : vector<16x32xf32>
    %79 = vector.broadcast %5 : vector<1x32xf32> to vector<16x32xf32>
    %80 = arith.addf %78, %79 : vector<16x32xf32>
    %c0_19 = arith.constant 0 : index
    %c0_20 = arith.constant 0 : index
    %81 = vector.load %arg3[%c0_19, %c0_20] : memref<32x64xf32, #tpu.memory_space<vmem>>, vector<32x64xf32>
    %cst_21 = arith.constant dense<0.000000e+00> : vector<16x64xf32>
    %82 = tpu.matmul %80, %81, %cst_21 {dimension_numbers = #tpu.dot_dimension_numbers<[1], [0], [0], [1], [0, 0, 1, 1], [], []>} : vector<16x32xf32>, vector<32x64xf32>, vector<16x64xf32> -> vector<16x64xf32>
    %83 = vector.broadcast %6 : vector<1x64xf32> to vector<16x64xf32>
    %84 = arith.addf %82, %83 : vector<16x64xf32>
    %cst_22 = arith.constant 0.000000e+00 : f32
    %85 = vector.broadcast %cst_22 : f32 to vector<16x64xf32>
    %86 = arith.maximumf %84, %85 : vector<16x64xf32>
    %c0_23 = arith.constant 0 : index
    %c0_24 = arith.constant 0 : index
    %87 = vector.load %arg4[%c0_23, %c0_24] : memref<64x32xf32, #tpu.memory_space<vmem>>, vector<64x32xf32>
    %cst_25 = arith.constant dense<0.000000e+00> : vector<16x32xf32>
    %88 = tpu.matmul %86, %87, %cst_25 {dimension_numbers = #tpu.dot_dimension_numbers<[1], [0], [0], [1], [0, 0, 1, 1], [], []>} : vector<16x64xf32>, vector<64x32xf32>, vector<16x32xf32> -> vector<16x32xf32>
    %89 = vector.broadcast %7 : vector<1x32xf32> to vector<16x32xf32>
    %90 = arith.addf %88, %89 : vector<16x32xf32>
    %91 = arith.addf %90, %80 : vector<16x32xf32>
    %cst_26 = arith.constant dense<0.000000e+00> : vector<16xf32>
    %92 = vector.multi_reduction <add>, %91, %cst_26 [1] : vector<16x32xf32> to vector<16xf32>
    %93 = vector.shape_cast %92 : vector<16xf32> to vector<16x1xf32>
    %cst_27 = arith.constant 3.200000e+01 : f32
    %94 = vector.broadcast %cst_27 : f32 to vector<16x1xf32>
    %95 = arith.divf %93, %94 : vector<16x1xf32>
    %96 = vector.broadcast %95 : vector<16x1xf32> to vector<16x32xf32>
    %97 = arith.subf %91, %96 : vector<16x32xf32>
    %98 = arith.mulf %97, %97 : vector<16x32xf32>
    %cst_28 = arith.constant dense<0.000000e+00> : vector<16xf32>
    %99 = vector.multi_reduction <add>, %98, %cst_28 [1] : vector<16x32xf32> to vector<16xf32>
    %100 = vector.shape_cast %99 : vector<16xf32> to vector<16x1xf32>
    %cst_29 = arith.constant 3.200000e+01 : f32
    %101 = vector.broadcast %cst_29 : f32 to vector<16x1xf32>
    %102 = arith.divf %100, %101 : vector<16x1xf32>
    %103 = vector.broadcast %95 : vector<16x1xf32> to vector<16x32xf32>
    %104 = arith.subf %91, %103 : vector<16x32xf32>
    %105 = vector.broadcast %8 : vector<1x32xf32> to vector<16x32xf32>
    %106 = arith.mulf %105, %104 : vector<16x32xf32>
    %cst_30 = arith.constant 9.99999974E-6 : f32
    %107 = vector.broadcast %cst_30 : f32 to vector<16x1xf32>
    %108 = arith.addf %102, %107 : vector<16x1xf32>
    %109 = math.rsqrt %108 : vector<16x1xf32>
    %110 = vector.broadcast %109 : vector<16x1xf32> to vector<16x32xf32>
    %111 = arith.mulf %106, %110 : vector<16x32xf32>
    %112 = vector.broadcast %9 : vector<1x32xf32> to vector<16x32xf32>
    %113 = arith.addf %111, %112 : vector<16x32xf32>
    %114 = vector.shape_cast %113 : vector<16x32xf32> to vector<2x8x32xf32>
    %c0_31 = arith.constant 0 : index
    %c0_32 = arith.constant 0 : index
    %c0_33 = arith.constant 0 : index
    %115 = vector.load %arg6[%c0_31, %c0_32, %c0_33] : memref<2x8x32xf32, #tpu.memory_space<vmem>>, vector<2x8x32xf32>
    tpu.vector_store %arg6[%c0_31, %c0_32, %c0_33], %114 {strides = array<i32>} : memref<2x8x32xf32, #tpu.memory_space<vmem>>, vector<2x8x32xf32>,
    return
  }
}

</mosaic_0001>

<bundles_post_ra>
// kernel: tpu_custom_call.1
= control target key start
LH: loop header
LB: loop body
LE: loop exit
PB: predicated region body
PF: predicated region fallthrough
CT: control target
= control target key end

     0   :  { %11 = vsyncpa [#allocation3], 0  ;;  %s1554_s0 = inlined_call_operand.hbm [shape: f32[2,8,32], index: 0, kind: input, shape index: {}]   ;;  %s1555_s1 = inlined_call_operand.vmem [shape: f32[32,96], index: 1, kind: input, shape index: {}]   ;;  %s1556_s2 = inlined_call_operand.vmem [shape: f32[32,32], index: 2, kind: input, shape index: {}]   ;;  %s1557_s3 = inlined_call_operand.vmem [shape: f32[32,64], index: 3, kind: input, shape index: {}]   ;;  %s1558_s4 = inlined_call_operand.vmem [shape: f32[64,32], index: 4, kind: input, shape index: {}]   ;;  %s1559_s5 = inlined_call_operand.hbm [shape: f32[8,96], index: 5, kind: input, shape index: {}]   ;;  %s1560_s6 = inlined_call_operand.hbm [shape: f32[2,8,32], index: 6, kind: output, shape index: {}]  }
   0x1   :  { %12 = vsyncpa [#allocation6], 0 }
   0x2   :  { %13 = vsyncpa [#allocation4], 0  ;;  %s18_s23 = sshll.u32 %s1554_s0, 4  ;;  %s1177_s24 = smov [#allocation2]   ;;  %s19_s23 = int_to_ptr.hbm [resolvable:$true] %s18_s23 }
   0x3   :  { %s20_s25 = sshll.u32 %s1177_s24, 4  ;;  %s40_s28 = sshll.u32 %s1559_s5, 4  ;;  %s21_s25 = int_to_ptr.vmem [resolvable:$true] %s20_s25  ;;  %s41_s28 = int_to_ptr.hbm [resolvable:$true] %s40_s28 }
   0x4   :  { %s1178_s29 = smov 128   ;;  %s1179_s30 = smov 8  }
   0x5   :  { %26 = dma.hbm_to_vmem [thread:$0]  %s19_s23, 256, %s21_s25, [#allocation3], %s1178_s29, %s1178_s29, %s1179_s30  }
   0x6   :  { %s1180_s7 = smov [#allocation5]  }
   0x7   :  { %s42_s8 = sshll.u32 %s1180_s7, 4  ;;  %s43_s8 = int_to_ptr.vmem [resolvable:$true] %s42_s8 }
   0x8   :  { %45 = dma.hbm_to_vmem [thread:$0]  %s41_s28, 128, %s43_s8, [#allocation6]  }
   0x9   :  { %1171 = dma.done.wait [#allocation3], 256  }
   0xa   :  { %1172 = vsyncadd [#allocation3], 4294967040 }
   0xb   :  { %1173 = dma.done.wait [#allocation6], 128  }
   0xc   :  { %1174 = vsyncadd [#allocation6], 4294967168  ;;  %v60_v0 = vld [vmem:[%s1555_s1 + $0x18] sm:$0xff]  ;;  %v59_v1 = vld [vmem:[%s1555_s1 + $0x10] sm:$0xff]  ;;  %vm62_vm0 = vcmask 261120   ;;  %s1182_s15 = smov 120  }
   0xd   :  { %81 = vmatpush.msra.mxu0 %v60_v0  ;;  %v58_v2 = vld [vmem:[%s1555_s1 + $0x8] sm:$0xff]  ;;  %v57_v3 = vld [vmem:[%s1555_s1] sm:$0xff]  ;;  %v1254_v6 = vld [vmem:[#allocation5] sm:$0xff]  ;;  %s1181_s1 = smov 104   ;;  %s1183_s16 = smov 112   ;;  %vm108_vm1 = vcmask 64512  }
   0xe   :  { %v1246_v4 = vld [vmem:[#allocation2] sm:$0xff]  ;;  %v1250_v5 = vld [vmem:[#allocation2 + $0x8] sm:$0xff]  ;;  %v61_v7 = vperm.slane %v1254_v6, 0  ;;  %s1184_s17 = smov 96   ;;  %s1185_s18 = smov 64  }
   0xf   :  { %82 = vmatpush.msra.mxu0 %v59_v1  ;;  %s1186_s19 = smov 16   ;;  %s1187_s20 = smov 24  }
  0x11   :  { %83 = vmatpush.msra.mxu0 %v58_v2 }
  0x13   :  { %84 = vmatpush.msra.mxu0 %v57_v3 }
  0x14   :  { %997 = vmatmul.msk.f32.vlgmr.msra.gmra.mxu0 %vm62_vm0, %v1246_v4 }
  0x1c   :  { %998 = vmatmul.msk.f32.gmra.mxu0 %vm62_vm0, %v1250_v5 }
  0x91   :  { %v86_v8 = vpop.f32.mrf.mxu0 }
  0x92   :  { %v1257_v9 = vadd.f32 %v86_v8, %v61_v7 }
  0x94   :  { %102 = vrot.lane.b32.xlu2 %v1257_v9, %s1181_s1  ;;  %94 = vrot.lane.b32.xlu0 %v1257_v9, %s1182_s15 }
  0x99   :  { %v89_v10 = vpop.f32.mrf.mxu0 }
  0x9a   :  { %v1261_v11 = vadd.f32 %v89_v10, %v61_v7 }
  0x9c   :  { %96 = vrot.lane.b32.xlu1 %v1261_v11, %s1182_s15  ;;  %100 = vrot.lane.b32.xlu2 %v1261_v11, %s1183_s16 }
  0x9d   :  { %98 = vrot.lane.b32.xlu0 %v1257_v9, %s1183_s16 }
  0xa4   :  { %104 = vrot.lane.b32.xlu1 %v1261_v11, %s1181_s1 }
  0xa5   :  { %106 = vrot.lane.b32.xlu0 %v1257_v9, %s1184_s17 }
  0xac   :  { %133 = vrot.lane.b32.xlu1 %v1261_v11, %s1184_s17 }
  0xee   :  { %v1272_v13 = vpop.permute.xlu2 %102 }
  0xf6   :  { %v1280_v16 = vpop.permute.xlu2 %100 }
 0x106   :  { %v1269_v12 = vpop.permute.xlu0 %94 }
 0x107   :  { %159 = vrot.lane.b32.xlu2 %v1269_v12, %s1184_s17  ;;  %v1042_v51 = vpack.i.bf16 %v1269_v12, %v1257_v9 }
 0x10e   :  { %v1274_v14 = vpop.permute.xlu1 %96 }
 0x10f   :  { %v1276_v15 = vpop.permute.xlu0 %98  ;;  %185 = vrot.lane.b32.xlu1 %v1274_v14, %s1184_s17 }
 0x110   :  { %211 = vrot.lane.b32.xlu0 %v1276_v15, %s1184_s17  ;;  %v1047_v50 = vpack.i.bf16 %v1274_v14, %v1276_v15 }
 0x116   :  { %v1282_v17 = vpop.permute.xlu1 %104 }
 0x117   :  { %v107_v18 = vpop.permute.xlu0 %106  ;;  %237 = vrot.lane.b32.xlu1 %v1280_v16, %s1184_s17  ;;  %289 = vrot.lane.b32.xlu2 %v1282_v17, %s1184_s17 }
 0x118   :  { %263 = vrot.lane.b32.xlu0 %v1272_v13, %s1184_s17  ;;  %999 = vmatpush.xpose.msk.msra.mxu2 %vm108_vm1, %v107_v18 }
 0x11b   :  { %1000 = vmatmul.msk.f32.vlgmr.msra.gmra.mxu2 %vm108_vm1, %v1257_v9 }
 0x11e   :  { %v134_v19 = vpop.permute.xlu1 %133 }
 0x11f   :  { %1001 = vmatpush.xpose.msk.msrb.mxu2 %vm108_vm1, %v134_v19 }
 0x123   :  { %1002 = vmatmul.msk.f32.vlgmr.msrb.gmra.mxu2 %vm108_vm1, %v1261_v11 }
 0x161   :  { %v160_v20 = vpop.permute.xlu2 %159 }
 0x162   :  { %1003 = vmatpush.xpose.msk.msra.mxu3 %vm108_vm1, %v160_v20 }
 0x165   :  { %1004 = vmatmul.msk.f32.vlgmr.msra.gmra.mxu3 %vm108_vm1, %v1269_v12 }
 0x171   :  { %v290_v23 = vpop.permute.xlu2 %289 }
 0x181   :  { %v186_v21 = vpop.permute.xlu1 %185 }
 0x182   :  { %v212_v22 = vpop.permute.xlu0 %211  ;;  %1005 = vmatpush.xpose.msk.msra.mxu1 %vm108_vm1, %v186_v21 }
 0x183   :  { %1007 = vmatpush.xpose.msk.msra.mxu2 %vm108_vm1, %v212_v22 }
 0x185   :  { %1006 = vmatmul.msk.f32.vlgmr.msra.gmra.mxu1 %vm108_vm1, %v1274_v14 }
 0x186   :  { %1008 = vmatmul.msk.f32.vlgmr.msra.gmra.mxu2 %vm108_vm1, %v1276_v15 }
 0x187   :  { %1013 = vmatpush.xpose.msk.msrb.mxu2 %vm108_vm1, %v290_v23 }
 0x189   :  { %v238_v24 = vpop.permute.xlu1 %237 }
 0x18a   :  { %v264_v25 = vpop.permute.xlu0 %263  ;;  %1009 = vmatpush.xpose.msk.msrb.mxu3 %vm108_vm1, %v238_v24 }
 0x18b   :  { %1011 = vmatpush.xpose.msk.msrb.mxu1 %vm108_vm1, %v264_v25 }
 0x18d   :  { %1010 = vmatmul.msk.f32.vlgmr.msrb.gmra.mxu3 %vm108_vm1, %v1280_v16 }
 0x18e   :  { %1012 = vmatmul.msk.f32.vlgmr.msrb.gmra.mxu1 %vm108_vm1, %v1272_v13  ;;  %1014 = vmatmul.msk.f32.vlgmr.msrb.gmra.mxu2 %vm108_vm1, %v1282_v17 }
 0x19e   :  { %v130_v26 = vpop.f32.mrf.mxu2 }
 0x19f   :  { %v315_v27 = vmul.f32 0.35355338, %v130_v26 }
 0x1a1   :  { %v323_v28 = vsel %vm108_vm1, %v315_v27, -inf }
 0x1a2   :  { %324 = vmax.xlane.f32.xlu2 %v323_v28 }
 0x1a6   :  { %v156_v32 = vpop.f32.mrf.mxu2 }
 0x1a7   :  { %v316_v36 = vmul.f32 0.35355338, %v156_v32 }
 0x1a9   :  { %v326_v42 = vsel %vm108_vm1, %v316_v36, -inf }
 0x1e8   :  { %v182_v29 = vpop.f32.mrf.mxu3 }
 0x1e9   :  { %v317_v30 = vmul.f32 0.35355338, %v182_v29 }
 0x1eb   :  { %v329_v31 = vsel %vm108_vm1, %v317_v30, -inf }
 0x1ec   :  { %330 = vmax.xlane.f32.xlu0 %v329_v31 }
 0x202   :  { %v208_v33 = vpop.f32.mrf.mxu1 }
 0x203   :  { %v318_v34 = vmul.f32 0.35355338, %v208_v33 }
 0x205   :  { %v332_v35 = vsel %vm108_vm1, %v318_v34, -inf }
 0x206   :  { %333 = vmax.xlane.f32.xlu2 %v332_v35 }
 0x209   :  { %v234_v37 = vpop.f32.mrf.mxu2 }
 0x20a   :  { %v319_v38 = vmul.f32 0.35355338, %v234_v37 }
 0x20b   :  { %v286_v39 = vpop.f32.mrf.mxu1 }
 0x20c   :  { %v321_v40 = vmul.f32 0.35355338, %v286_v39  ;;  %v335_v41 = vsel %vm108_vm1, %v319_v38, -inf }
 0x20d   :  { %336 = vmax.xlane.f32.xlu1 %v335_v41  ;;  %v1052_v41 = vpack.i.bf16 %v1272_v13, %v1261_v11 }
 0x20e   :  { %327 = vmax.xlane.f32.xlu2 %v326_v42  ;;  %v341_v43 = vsel %vm108_vm1, %v321_v40, -inf }
 0x20f   :  { %342 = vmax.xlane.f32.xlu0 %v341_v43 }
 0x210   :  { %v260_v44 = vpop.f32.mrf.mxu3 }
 0x211   :  { %v320_v45 = vmul.f32 0.35355338, %v260_v44  ;;  %v312_v46 = vpop.f32.mrf.mxu2 }
 0x212   :  { %v322_v47 = vmul.f32 0.35355338, %v312_v46 }
 0x213   :  { %v338_v49 = vsel %vm108_vm1, %v320_v45, -inf }
 0x214   :  { %v344_v48 = vsel %vm108_vm1, %v322_v47, -inf }
 0x215   :  { %345 = vmax.xlane.f32.xlu1 %v344_v48  ;;  %v325_v52 = vpop.xlane.xlu2 %324 }
 0x216   :  { %339 = vmax.xlane.f32.xlu2 %v338_v49  ;;  %v347_v53 = vsub.f32 %v315_v27, %v325_v52 }
 0x218   :  { %v355_v54 = vmul.f32 1.442695, %v347_v53 }
 0x21a   :  { %1057 = vpow2.f32 %v355_v54 }
 0x220   :  { %v1325_v55 = vpop.eup %1057 }
 0x221   :  { %v371_v56 = vsel %vm108_vm1, %v1325_v55, 0.0 }
 0x223   :  { %1048 = vrot.lane.b32.xlu0 %v1047_v50, %s1185_s18 }
 0x22e   :  { %1043 = vrot.lane.b32.xlu1 %v1042_v51, %s1185_s18 }
 0x24d   :  { %372 = vadd.xlane.f32.xlu0 %v371_v56 }
 0x25f   :  { %v331_v61 = vpop.xlane.xlu0 %330 }
 0x260   :  { %v349_v3 = vsub.f32 %v317_v30, %v331_v61 }
 0x262   :  { %v359_v9 = vmul.f32 1.442695, %v349_v3 }
 0x279   :  { %v334_v57 = vpop.xlane.xlu2 %333 }
 0x27a   :  { %v350_v58 = vsub.f32 %v318_v34, %v334_v57 }
 0x27c   :  { %v361_v59 = vmul.f32 1.442695, %v350_v58 }
 0x27e   :  { %1059 = vpow2.f32 %v361_v59 }
 0x280   :  { %v337_v60 = vpop.xlane.xlu1 %336 }
 0x281   :  { %v351_v62 = vsub.f32 %v319_v38, %v337_v60  ;;  %v328_v63 = vpop.xlane.xlu2 %327 }
 0x282   :  { %v348_v0 = vsub.f32 %v316_v36, %v328_v63  ;;  %v343_v12 = vpop.xlane.xlu0 %342 }
 0x283   :  { %v363_v1 = vmul.f32 1.442695, %v351_v62  ;;  %v353_v22 = vsub.f32 %v321_v40, %v343_v12 }
 0x284   :  { %v1329_v2 = vpop.eup %1059  ;;  %v357_v7 = vmul.f32 1.442695, %v348_v0 }
 0x285   :  { %1061 = vpow2.f32 %v363_v1  ;;  %v380_v8 = vsel %vm108_vm1, %v1329_v2, 0.0  ;;  %v367_v26 = vmul.f32 1.442695, %v353_v22 }
 0x286   :  { %1063 = vpow2.f32 %v357_v7  ;;  %381 = vadd.xlane.f32.xlu0 %v380_v8 }
 0x287   :  { %1065 = vpow2.f32 %v359_v9 }
 0x288   :  { %v346_v10 = vpop.xlane.xlu1 %345 }
 0x289   :  { %v354_v14 = vsub.f32 %v322_v47, %v346_v10  ;;  %v340_v15 = vpop.xlane.xlu2 %339 }
 0x28a   :  { %v352_v18 = vsub.f32 %v320_v45, %v340_v15 }
 0x28b   :  { %v1333_v19 = vpop.eup %1061  ;;  %v369_v20 = vmul.f32 1.442695, %v354_v14 }
 0x28c   :  { %v1335_v21 = vpop.eup %1063  ;;  %v365_v23 = vmul.f32 1.442695, %v352_v18  ;;  %v383_v24 = vsel %vm108_vm1, %v1333_v19, 0.0 }
 0x28d   :  { %1067 = vpow2.f32 %v369_v20  ;;  %384 = vadd.xlane.f32.xlu2 %v383_v24  ;;  %v374_v25 = vsel %vm108_vm1, %v1335_v21, 0.0  ;;  %v1341_v27 = vpop.eup %1065 }
 0x28e   :  { %1069 = vpow2.f32 %v365_v23  ;;  %375 = vadd.xlane.f32.xlu1 %v374_v25  ;;  %v377_v33 = vsel %vm108_vm1, %v1341_v27, 0.0 }
 0x28f   :  { %1071 = vpow2.f32 %v367_v26 }
 0x293   :  { %v1343_v28 = vpop.eup %1067 }
 0x294   :  { %v1345_v29 = vpop.eup %1069  ;;  %v392_v30 = vsel %vm108_vm1, %v1343_v28, 0.0 }
 0x295   :  { %393 = vadd.xlane.f32.xlu0 %v392_v30  ;;  %v1049_v31 = vpop.permute.xlu0 %1048  ;;  %v386_v32 = vsel %vm108_vm1, %v1345_v29, 0.0  ;;  %v1353_v35 = vpop.eup %1071 }
 0x296   :  { %v1051_v34 = vunpack.i.h.bf16 %v1049_v31  ;;  %387 = vadd.xlane.f32.xlu2 %v386_v32  ;;  %378 = vadd.xlane.f32.xlu1 %v377_v33  ;;  %v389_v36 = vsel %vm108_vm1, %v1353_v35, 0.0  ;;  %v1050_v40 = vunpack.i.l.bf16 %v1049_v31 }
 0x298   :  { %614 = vmatpush.msra.mxu2 %v1051_v34 }
 0x29e   :  { %390 = vadd.xlane.f32.xlu2 %v389_v36 }
 0x2a0   :  { %v1044_v37 = vpop.permute.xlu1 %1043 }
 0x2a1   :  { %v1046_v38 = vunpack.i.h.bf16 %v1044_v37  ;;  %v1045_v39 = vunpack.i.l.bf16 %v1044_v37 }
 0x2a3   :  { %536 = vmatpush.msra.mxu3 %v1045_v39  ;;  %588 = vmatpush.msra.mxu1 %v1046_v38 }
 0x2a5   :  { %640 = vmatpush.msrb.mxu3 %v1050_v40 }
 0x2a9   :  { %645 = vrot.lane.b32.xlu0 %v1280_v16, %s1185_s18 }
 0x2af   :  { %697 = vrot.lane.b32.xlu1 %v1282_v17, %s1185_s18 }
 0x2b6   :  { %1053 = vrot.lane.b32.xlu2 %v1052_v41, %s1185_s18  ;;  %v757_v41 = vld [vmem:[%s1556_s2 + $0x10] sm:$0xff] }
 0x2c0   :  { %v373_v42 = vpop.xlane.xlu0 %372 }
 0x2c1   :  { %1073 = vrcp.f32 %v373_v42  ;;  %v406_v46 = vand.u32 2147483648, %v373_v42  ;;  %v404_v48 = vand.u32 2147483647, %v373_v42  ;;  %vm400_vm3 = vweird.f32 %v373_v42 }
 0x2c3   :  { %v407_v16 = vor.u32 1.1754944e-38, %v406_v46  ;;  %vm405_vm5 = vcmp.eq.f32.partialorder %v404_v48, 8.507059e+37 }
 0x2c7   :  { %v1074_v43 = vpop.eup %1073 }
 0x2c8   :  { %v396_v44 = vmul.f32 %v1074_v43, %v373_v42  ;;  %vm401_vm2 = vweird.f32 %v1074_v43 }
 0x2c9   :  { %vm402_vm4 = vmor %vm400_vm3, %vm401_vm2 }
 0x2ca   :  { %v397_v45 = vsub.f32 1.0, %v396_v44 }
 0x2cc   :  { %v398_v47 = vmul.f32 %v1074_v43, %v397_v45 }
 0x2ce   :  { %v399_v49 = vadd.f32 %v1074_v43, %v398_v47 }
 0x2d0   :  { %v403_v50 = vsel %vm402_vm4, %v1074_v43, %v399_v49  ;;  %v755_v43 = vld [vmem:[%s1556_s2] sm:$0xff] }
 0x2d1   :  { %v408_v17 = vsel %vm405_vm5, %v407_v16, %v403_v50 }
 0x2d2   :  { %v507_v11 = vmul.f32 %v1325_v55, %v408_v17 }
 0x2d4   :  { %1015 = vmatmul.msk.f32.vlgmr.msra.gmra.mxu3 %vm108_vm1, %v507_v11 }
 0x2f9   :  { %v382_v13 = vpop.xlane.xlu0 %381 }
 0x2fa   :  { %1075 = vrcp.f32 %v382_v13  ;;  %v448_v58 = vand.u32 2147483648, %v382_v13  ;;  %vm442_vm7 = vweird.f32 %v382_v13  ;;  %v446_v61 = vand.u32 2147483647, %v382_v13 }
 0x2fc   :  { %v449_v7 = vor.u32 1.1754944e-38, %v448_v58  ;;  %vm447_vm9 = vcmp.eq.f32.partialorder %v446_v61, 8.507059e+37  ;;  %v1188_v61 = vmov 32.0  }
 0x300   :  { %v1076_v51 = vpop.eup %1075  ;;  %v385_v52 = vpop.xlane.xlu2 %384 }
 0x301   :  { %v438_v53 = vmul.f32 %v1076_v51, %v382_v13  ;;  %1077 = vrcp.f32 %v385_v52  ;;  %v376_v54 = vpop.xlane.xlu1 %375  ;;  %vm443_vm6 = vweird.f32 %v1076_v51  ;;  %v462_v10 = vand.u32 2147483648, %v385_v52 }
 0x302   :  { %1079 = vrcp.f32 %v376_v54  ;;  %vm444_vm8 = vmor %vm442_vm7, %vm443_vm6  ;;  %v460_v18 = vand.u32 2147483647, %v385_v52  ;;  %vm456_vm11 = vweird.f32 %v385_v52  ;;  %v418_v25 = vand.u32 2147483647, %v376_v54 }
 0x303   :  { %v439_v56 = vsub.f32 1.0, %v438_v53  ;;  %v463_v24 = vor.u32 1.1754944e-38, %v462_v10  ;;  %v420_v31 = vand.u32 2147483648, %v376_v54  ;;  %vm414_vm15 = vweird.f32 %v376_v54 }
 0x304   :  { %vm461_vm13 = vcmp.eq.f32.partialorder %v460_v18, 8.507059e+37  ;;  %vm1395_vm2 = vcmp.eq.f32.partialorder %v418_v25, 8.507059e+37 }
 0x305   :  { %v440_v57 = vmul.f32 %v1076_v51, %v439_v56  ;;  %v421_v44 = vor.u32 1.1754944e-38, %v420_v31 }
 0x307   :  { %v1078_v59 = vpop.eup %1077  ;;  %v441_v60 = vadd.f32 %v1076_v51, %v440_v57 }
 0x308   :  { %v1366_v62 = vpop.eup %1079  ;;  %v452_v55 = vmul.f32 %v1078_v59, %v385_v52  ;;  %v1368_v63 = vpop.xlane.xlu0 %393  ;;  %vm457_vm10 = vweird.f32 %v1078_v59 }
 0x309   :  { %v445_v0 = vsel %vm444_vm8, %v1076_v51, %v441_v60  ;;  %v410_v1 = vmul.f32 %v1366_v62, %v376_v54  ;;  %1081 = vrcp.f32 %v1368_v63  ;;  %v1372_v3 = vpop.xlane.xlu2 %387  ;;  %v1374_v9 = vpop.xlane.xlu1 %378  ;;  %vm458_vm12 = vmor %vm456_vm11, %vm457_vm10  ;;  %vm415_vm14 = vweird.f32 %v1366_v62 }
 0x30a   :  { %v453_v8 = vsub.f32 1.0, %v452_v55  ;;  %1083 = vrcp.f32 %v1372_v3  ;;  %v450_v14 = vsel %vm447_vm9, %v449_v7, %v445_v0  ;;  %vm1400_vm3 = vmor %vm414_vm15, %vm415_vm14  ;;  %vm498_vm4 = vweird.f32 %v1368_v63 }
 0x30b   :  { %v411_v12 = vsub.f32 1.0, %v410_v1  ;;  %1085 = vrcp.f32 %v1374_v9  ;;  %v510_v26 = vmul.f32 %v1329_v2, %v450_v14  ;;  %v502_v2 = vand.u32 2147483647, %v1368_v63 }
 0x30c   :  { %v454_v15 = vmul.f32 %v1078_v59, %v453_v8  ;;  %v504_v48 = vand.u32 2147483648, %v1368_v63  ;;  %vm470_vm5 = vweird.f32 %v1372_v3  ;;  %v474_v50 = vand.u32 2147483647, %v1372_v3 }
 0x30d   :  { %v412_v20 = vmul.f32 %v1366_v62, %v411_v12  ;;  %1018 = vmatmul.msk.f32.vlgmr.msra.gmra.mxu2 %vm108_vm1, %v510_v26  ;;  %vm1413_vm6 = vcmp.eq.f32.partialorder %v502_v2, 8.507059e+37  ;;  %v476_v13 = vand.u32 2147483648, %v1372_v3  ;;  %v434_v51 = vand.u32 2147483648, %v1374_v9 }
 0x30e   :  { %v455_v22 = vadd.f32 %v1078_v59, %v454_v15  ;;  %v432_v54 = vand.u32 2147483647, %v1374_v9  ;;  %v505_v57 = vor.u32 1.1754944e-38, %v504_v48  ;;  %vm428_vm11 = vweird.f32 %v1374_v9 }
 0x30f   :  { %v1379_v23 = vpop.eup %1081  ;;  %v413_v36 = vadd.f32 %v1366_v62, %v412_v20  ;;  %v435_v7 = vor.u32 1.1754944e-38, %v434_v51  ;;  %v759_v51 = vperm.slane %v1254_v6, 1 }
 0x310   :  { %v459_v30 = vsel %vm458_vm12, %v1078_v59, %v455_v22  ;;  %v494_v32 = vmul.f32 %v1379_v23, %v1368_v63  ;;  %v1384_v33 = vpop.eup %1083  ;;  %vm499_vm7 = vweird.f32 %v1379_v23  ;;  %vm433_vm14 = vcmp.eq.f32.partialorder %v432_v54, 8.507059e+37 }
 0x311   :  { %v464_v34 = vsel %vm461_vm13, %v463_v24, %v459_v30  ;;  %v1389_v37 = vpop.xlane.xlu2 %390  ;;  %v466_v39 = vmul.f32 %v1384_v33, %v1372_v3  ;;  %v1086_v40 = vpop.eup %1085  ;;  %vm471_vm9 = vweird.f32 %v1384_v33  ;;  %vm1431_vm10 = vmor %vm498_vm4, %vm499_vm7  ;;  %v477_v22 = vor.u32 1.1754944e-38, %v476_v13 }
 0x312   :  { %v495_v38 = vsub.f32 1.0, %v494_v32  ;;  %1087 = vrcp.f32 %v1389_v37  ;;  %v511_v42 = vmul.f32 %v1333_v19, %v464_v34  ;;  %v424_v47 = vmul.f32 %v1086_v40, %v1374_v9  ;;  %vm1442_vm13 = vmor %vm470_vm5, %vm471_vm9 }
 0x313   :  { %v467_v46 = vsub.f32 1.0, %v466_v39  ;;  %v417_v19 = vsel %vm1400_vm3, %v1366_v62, %v413_v36  ;;  %vm429_vm8 = vweird.f32 %v1086_v40  ;;  %v488_v9 = vand.u32 2147483647, %v1389_v37 }
 0x314   :  { %v496_v45 = vmul.f32 %v1379_v23, %v495_v38  ;;  %1019 = vmatmul.msk.f32.vlgmr.msrb.gmra.mxu3 %vm108_vm1, %v511_v42  ;;  %v425_v17 = vsub.f32 1.0, %v424_v47  ;;  %v422_v56 = vsel %vm1395_vm2, %v421_v44, %v417_v19  ;;  %vm430_vm12 = vmor %vm428_vm11, %vm429_vm8  ;;  %v490_v14 = vand.u32 2147483648, %v1389_v37  ;;  %v756_v42 = vld [vmem:[%s1556_s2 + $0x8] sm:$0xff] }
 0x315   :  { %v468_v16 = vmul.f32 %v1384_v33, %v467_v46  ;;  %v508_v10 = vmul.f32 %v1335_v21, %v422_v56  ;;  %vm475_vm2 = vcmp.eq.f32.partialorder %v474_v50, 8.507059e+37  ;;  %vm484_vm3 = vweird.f32 %v1389_v37 }
 0x316   :  { %v497_v11 = vadd.f32 %v1379_v23, %v496_v45  ;;  %v426_v53 = vmul.f32 %v1086_v40, %v425_v17  ;;  %v491_v26 = vor.u32 1.1754944e-38, %v490_v14  ;;  %vm489_vm5 = vcmp.eq.f32.partialorder %v488_v9, 8.507059e+37 }
 0x317   :  { %v469_v58 = vadd.f32 %v1384_v33, %v468_v16  ;;  %vm752_vm7 = vcmask 195584   ;;  %1089 = vrcp.f32 %v1188_v61 }
 0x318   :  { %v1088_v52 = vpop.eup %1087  ;;  %v427_v62 = vadd.f32 %v1086_v40, %v426_v53  ;;  %v501_v1 = vsel %vm1431_vm10, %v1379_v23, %v497_v11 }
 0x319   :  { %v480_v59 = vmul.f32 %v1088_v52, %v1389_v37  ;;  %v1054_v60 = vpop.permute.xlu2 %1053  ;;  %v473_v15 = vsel %vm1442_vm13, %v1384_v33, %v469_v58  ;;  %vm485_vm15 = vweird.f32 %v1088_v52  ;;  %v506_v20 = vsel %vm1413_vm6, %v505_v57, %v501_v1 }
 0x31a   :  { %v1056_v55 = vunpack.i.h.bf16 %v1054_v60  ;;  %v1055_v0 = vunpack.i.l.bf16 %v1054_v60  ;;  %v431_v12 = vsel %vm430_vm12, %v1086_v40, %v427_v62  ;;  %v478_v25 = vsel %vm475_vm2, %v477_v22, %v473_v15  ;;  %vm486_vm4 = vmor %vm484_vm3, %vm485_vm15  ;;  %v849_v22 = vld [vmem:[%s1557_s3 + $0x8] sm:$0xff] }
 0x31b   :  { %v481_v8 = vsub.f32 1.0, %v480_v59  ;;  %v436_v18 = vsel %vm433_vm14, %v435_v7, %v431_v12  ;;  %v646_v3 = vpop.permute.xlu0 %645  ;;  %v514_v32 = vmul.f32 %v1343_v28, %v506_v20  ;;  %vm749_vm6 = vcmask 130048   ;;  %v850_v20 = vld [vmem:[%s1557_s3 + $0x10] sm:$0xff] }
 0x31c   :  { %562 = vmatpush.msrb.mxu0 %v1055_v0  ;;  %692 = vmatpush.msrb.mxu1 %v1056_v55  ;;  %v509_v23 = vmul.f32 %v1341_v27, %v436_v18  ;;  %v512_v27 = vmul.f32 %v1345_v29, %v478_v25  ;;  %vm893_vm14 = vcmask 523264  }
 0x31d   :  { %v482_v21 = vmul.f32 %v1088_v52, %v481_v8  ;;  %1016 = vmatmul.msk.f32.vlgmr.msrb.gmra.mxu0 %vm108_vm1, %v508_v10  ;;  %v1090_v62 = vpop.eup %1089 }
 0x31e   :  { %666 = vmatpush.msra.mxu0 %v646_v3  ;;  %1017 = vmatmul.msk.f32.vlgmr.msra.gmra.mxu1 %vm108_vm1, %v509_v23  ;;  %v798_v55 = vmul.f32 32.0, %v1090_v62  ;;  %v851_v3 = vld [vmem:[%s1557_s3 + $0x18] sm:$0xff]  ;;  %v848_v23 = vld [vmem:[%s1557_s3] sm:$0xff] }
 0x31f   :  { %v483_v24 = vadd.f32 %v1088_v52, %v482_v21 }
 0x320   :  { %v799_v0 = vsub.f32 1.0, %v798_v55  ;;  %871 = vmatpush.msrb.mxu0 %v851_v3 }
 0x321   :  { %v487_v30 = vsel %vm486_vm4, %v1088_v52, %v483_v24  ;;  %v698_v31 = vpop.permute.xlu1 %697 }
 0x322   :  { %v492_v33 = vsel %vm489_vm5, %v491_v26, %v487_v30  ;;  %718 = vmatpush.msrb.mxu2 %v698_v31  ;;  %v800_v1 = vmul.f32 %v1090_v62, %v799_v0  ;;  %872 = vmatpush.msrb.mxu0 %v850_v20  ;;  %v891_v30 = vld [vmem:[%s1558_s4 + $0x38] sm:$0xff]  ;;  %v890_v31 = vld [vmem:[%s1558_s4 + $0x30] sm:$0xff] }
 0x323   :  { %1022 = vmatmul.msk.f32.vlgmr.msrb.gmra.mxu2 %vm108_vm1, %v514_v32  ;;  %v513_v34 = vmul.f32 %v1353_v35, %v492_v33  ;;  %v758_v35 = vld [vmem:[%s1556_s2 + $0x18] sm:$0xff]  ;;  %908 = vmatpush.msra.mxu1 %v891_v30  ;;  %v889_v32 = vld [vmem:[%s1558_s4 + $0x28] sm:$0xff]  ;;  %v888_v33 = vld [vmem:[%s1558_s4 + $0x20] sm:$0xff]  ;;  %s983_s2 = sshll.u32 %s1560_s6, 4  ;;  %s984_s2 = int_to_ptr.hbm [resolvable:$true] %s983_s2 }
 0x324   :  { %778 = vmatpush.msra.mxu3 %v758_v35  ;;  %v801_v7 = vadd.f32 %v1090_v62, %v800_v1  ;;  %873 = vmatpush.msrb.mxu0 %v849_v22 }
 0x325   :  { %1020 = vmatmul.msk.f32.vlgmr.msra.gmra.mxu0 %vm108_vm1, %v512_v27  ;;  %909 = vmatpush.msra.mxu1 %v890_v31 }
 0x326   :  { %1021 = vmatmul.msk.f32.vlgmr.msrb.gmra.mxu1 %vm108_vm1, %v513_v34  ;;  %779 = vmatpush.msra.mxu3 %v757_v41 }
 0x327   :  { %874 = vmatpush.msrb.mxu0 %v848_v23  ;;  %910 = vmatpush.msra.mxu1 %v889_v32 }
 0x328   :  { %780 = vmatpush.msra.mxu3 %v756_v42 }
 0x329   :  { %911 = vmatpush.msra.mxu1 %v888_v33 }
 0x32a   :  { %781 = vmatpush.msra.mxu3 %v755_v43 }
 0x357   :  { %v538_v36 = vpop.f32.mrf.mxu3 }
 0x390   :  { %v616_v39 = vpop.f32.mrf.mxu2 }
 0x397   :  { %v642_v37 = vpop.f32.mrf.mxu3 }
 0x398   :  { %733 = vrot.lane.b32.xlu0 %v642_v37, %s1186_s19 }
 0x39a   :  { %v564_v38 = vpop.f32.mrf.mxu0 }
 0x39b   :  { %v590_v2 = vpop.f32.mrf.mxu1 }
 0x39c   :  { %725 = vrot.lane.b32.xlu1 %v590_v2, %s1179_s30 }
 0x3a2   :  { %v668_v28 = vpop.f32.mrf.mxu0 }
 0x3a3   :  { %735 = vrot.lane.b32.xlu0 %v668_v28, %s1186_s19  ;;  %v694_v40 = vpop.f32.mrf.mxu1 }
 0x3a4   :  { %741 = vrot.lane.b32.xlu2 %v694_v40, %s1187_s20  ;;  %727 = vrot.lane.b32.xlu1 %v616_v39, %s1179_s30  ;;  %v818_v40 = vperm.slane %v1254_v6, 2 }
 0x3a6   :  { %v720_v29 = vpop.f32.mrf.mxu2 }
 0x3ac   :  { %743 = vrot.lane.b32.xlu2 %v720_v29, %s1187_s20 }
 0x3fe   :  { %v742_v45 = vpop.permute.xlu2 %741 }
 0x406   :  { %v744_v17 = vpop.permute.xlu2 %743 }
 0x40a   :  { %v734_v44 = vpop.permute.xlu0 %733 }
 0x40e   :  { %v726_v46 = vpop.permute.xlu1 %725 }
 0x40f   :  { %v747_v47 = vsel %vm108_vm1, %v538_v36, %v726_v46  ;;  %v887_v36 = vld [vmem:[%s1558_s4 + $0x18] sm:$0xff] }
 0x410   :  { %v750_v48 = vsel %vm749_vm6, %v747_v47, %v734_v44  ;;  %912 = vmatpush.msra.mxu1 %v887_v36  ;;  %v845_v44 = vperm.slane %v1254_v6, 3 }
 0x411   :  { %v753_v19 = vsel %vm752_vm7, %v750_v48, %v742_v45 }
 0x412   :  { %1023 = vmatmul.msk.f32.vlgmr.msra.gmra.mxu3 %vm62_vm0, %v753_v19 }
 0x415   :  { %v736_v49 = vpop.permute.xlu0 %735 }
 0x416   :  { %v728_v16 = vpop.permute.xlu1 %727 }
 0x417   :  { %v748_v50 = vsel %vm108_vm1, %v564_v38, %v728_v16  ;;  %vm802_vm1 = vweird.f32 %v1090_v62 }
 0x418   :  { %v751_v11 = vsel %vm749_vm6, %v748_v50, %v736_v49  ;;  %v1486_v8 = vsel %vm802_vm1, %v1090_v62, %v801_v7  ;;  %v892_v62 = vperm.slane %v1254_v6, 5 }
 0x419   :  { %v754_v13 = vsel %vm752_vm7, %v751_v11, %v744_v17 }
 0x41a   :  { %1024 = vmatmul.msk.f32.gmra.mxu3 %vm62_vm0, %v754_v13 }
 0x495   :  { %v783_v52 = vpop.f32.mrf.mxu3 }
 0x496   :  { %v784_v53 = vadd.f32 %v783_v52, %v759_v51  ;;  %v885_v52 = vld [vmem:[%s1558_s4 + $0x8] sm:$0xff] }
 0x498   :  { %v789_v54 = vadd.f32 %v784_v53, %v1246_v4  ;;  %v884_v53 = vld [vmem:[%s1558_s4] sm:$0xff] }
 0x49a   :  { %v791_v56 = vsel %vm62_vm0, %v789_v54, 0.0 }
 0x49b   :  { %792 = vadd.xlane.f32.xlu1 %v791_v56 }
 0x49d   :  { %v786_v57 = vpop.f32.mrf.mxu3 }
 0x49e   :  { %v787_v58 = vadd.f32 %v786_v57, %v759_v51  ;;  %v886_v51 = vld [vmem:[%s1558_s4 + $0x10] sm:$0xff]  ;;  %s1189_s4 = smov [#allocation7]  }
 0x49f   :  { %913 = vmatpush.msra.mxu1 %v886_v51  ;;  %s981_s26 = sshll.u32 %s1189_s4, 4  ;;  %s982_s26 = int_to_ptr.vmem [resolvable:$true] %s981_s26 }
 0x4a0   :  { %v790_v59 = vadd.f32 %v787_v58, %v1250_v5 }
 0x4a1   :  { %914 = vmatpush.msra.mxu1 %v885_v52 }
 0x4a2   :  { %v794_v60 = vsel %vm62_vm0, %v790_v59, 0.0 }
 0x4a3   :  { %795 = vadd.xlane.f32.xlu0 %v794_v60  ;;  %915 = vmatpush.msra.mxu1 %v884_v53 }
 0x50e   :  { %v793_v4 = vpop.xlane.xlu1 %792 }
 0x50f   :  { %v804_v10 = vmul.f32 %v1486_v8, %v793_v4 }
 0x511   :  { %v806_v63 = vsub.f32 %v789_v54, %v804_v10  ;;  %v852_v54 = vperm.slane %v1254_v6, 4 }
 0x513   :  { %v808_v12 = vmul.f32 %v806_v63, %v806_v63  ;;  %v819_v43 = vmul.f32 %v818_v40, %v806_v63 }
 0x515   :  { %v810_v5 = vsel %vm62_vm0, %v808_v12, 0.0 }
 0x516   :  { %811 = vadd.xlane.f32.xlu2 %v810_v5  ;;  %v796_v9 = vpop.xlane.xlu0 %795 }
 0x517   :  { %v805_v14 = vmul.f32 %v1486_v8, %v796_v9 }
 0x519   :  { %v807_v15 = vsub.f32 %v790_v59, %v805_v14 }
 0x51b   :  { %v809_v18 = vmul.f32 %v807_v15, %v807_v15  ;;  %v820_v50 = vmul.f32 %v818_v40, %v807_v15 }
 0x51d   :  { %v813_v21 = vsel %vm62_vm0, %v809_v18, 0.0 }
 0x51e   :  { %814 = vadd.xlane.f32.xlu1 %v813_v21 }
 0x589   :  { %v812_v24 = vpop.xlane.xlu2 %811 }
 0x58a   :  { %v816_v25 = vmul.f32 %v812_v24, %v1486_v8 }
 0x58c   :  { %v821_v26 = vadd.f32 1e-05, %v816_v25 }
 0x58e   :  { %1091 = vrsqrt.f32 %v821_v26  ;;  %vm829_vm9 = vweird.f32 %v821_v26 }
 0x591   :  { %v815_v27 = vpop.xlane.xlu1 %814 }
 0x592   :  { %v817_v34 = vmul.f32 %v815_v27, %v1486_v8 }
 0x594   :  { %v1092_v37 = vpop.eup %1091  ;;  %v822_v38 = vadd.f32 1e-05, %v817_v34 }
 0x595   :  { %v824_v2 = vmul.f32 %v1092_v37, %v821_v26  ;;  %vm830_vm8 = vweird.f32 %v1092_v37 }
 0x596   :  { %1093 = vrsqrt.f32 %v822_v38  ;;  %vm831_vm10 = vmor %vm829_vm9, %vm830_vm8  ;;  %vm839_vm12 = vweird.f32 %v822_v38 }
 0x597   :  { %v825_v28 = vmul.f32 %v1092_v37, %v824_v2 }
 0x599   :  { %v826_v39 = vmul.f32 0.5, %v825_v28 }
 0x59b   :  { %v827_v29 = vsub.f32 1.5, %v826_v39 }
 0x59c   :  { %v1094_v35 = vpop.eup %1093 }
 0x59d   :  { %v828_v41 = vmul.f32 %v1092_v37, %v827_v29  ;;  %v834_v42 = vmul.f32 %v1094_v35, %v822_v38  ;;  %vm840_vm11 = vweird.f32 %v1094_v35  ;;  %v972_v29 = vperm.slane %v1254_v6, 7 }
 0x59e   :  { %vm841_vm13 = vmor %vm839_vm12, %vm840_vm11 }
 0x59f   :  { %v832_v45 = vsel %vm831_vm10, %v1092_v37, %v828_v41  ;;  %v835_v46 = vmul.f32 %v1094_v35, %v834_v42  ;;  %v945_v37 = vperm.slane %v1254_v6, 6 }
 0x5a0   :  { %v843_v47 = vmul.f32 %v832_v45, %v819_v43 }
 0x5a1   :  { %v836_v48 = vmul.f32 0.5, %v835_v46 }
 0x5a2   :  { %v846_v19 = vadd.f32 %v845_v44, %v843_v47 }
 0x5a3   :  { %v837_v49 = vsub.f32 1.5, %v836_v48 }
 0x5a4   :  { %1025 = vmatmul.msk.f32.vlgmr.msrb.gmra.mxu0 %vm62_vm0, %v846_v19 }
 0x5a5   :  { %v838_v16 = vmul.f32 %v1094_v35, %v837_v49 }
 0x5a7   :  { %v842_v17 = vsel %vm841_vm13, %v1094_v35, %v838_v16 }
 0x5a8   :  { %v844_v11 = vmul.f32 %v842_v17, %v820_v50 }
 0x5aa   :  { %v847_v13 = vadd.f32 %v845_v44, %v844_v11 }
 0x5ac   :  { %1026 = vmatmul.msk.f32.gmra.mxu0 %vm62_vm0, %v847_v13 }
 0x621   :  { %v876_v56 = vpop.f32.mrf.mxu0 }
 0x622   :  { %v877_v57 = vadd.f32 %v876_v56, %v852_v54 }
 0x624   :  { %v882_v58 = vmax.f32 %v877_v57, 0.0 }
 0x626   :  { %1027 = vmatmul.msk.f32.vlgmr.msra.gmra.mxu1 %vm893_vm14, %v882_v58 }
 0x629   :  { %v879_v59 = vpop.f32.mrf.mxu0 }
 0x62a   :  { %v880_v60 = vadd.f32 %v879_v59, %v852_v54 }
 0x62c   :  { %v883_v61 = vmax.f32 %v880_v60, 0.0 }
 0x62e   :  { %1028 = vmatmul.msk.f32.gmra.mxu1 %vm893_vm14, %v883_v61 }
 0x6a3   :  { %v917_v55 = vpop.f32.mrf.mxu1 }
 0x6a4   :  { %v918_v0 = vadd.f32 %v917_v55, %v892_v62 }
 0x6a6   :  { %v923_v1 = vadd.f32 %v918_v0, %v846_v19 }
 0x6a8   :  { %v925_v7 = vsel %vm62_vm0, %v923_v1, 0.0 }
 0x6a9   :  { %926 = vadd.xlane.f32.xlu0 %v925_v7 }
 0x6ab   :  { %v920_v4 = vpop.f32.mrf.mxu1 }
 0x6ac   :  { %v921_v10 = vadd.f32 %v920_v4, %v892_v62 }
 0x6ae   :  { %v924_v63 = vadd.f32 %v921_v10, %v847_v13 }
 0x6b0   :  { %v928_v12 = vsel %vm62_vm0, %v924_v63, 0.0 }
 0x6b1   :  { %929 = vadd.xlane.f32.xlu2 %v928_v12 }
 0x71c   :  { %v927_v5 = vpop.xlane.xlu0 %926 }
 0x71d   :  { %v931_v9 = vmul.f32 %v927_v5, %v1486_v8 }
 0x71f   :  { %v933_v14 = vsub.f32 %v923_v1, %v931_v9 }
 0x721   :  { %v935_v15 = vmul.f32 %v933_v14, %v933_v14  ;;  %v946_v40 = vmul.f32 %v945_v37, %v933_v14 }
 0x723   :  { %v937_v18 = vsel %vm62_vm0, %v935_v15, 0.0 }
 0x724   :  { %v930_v21 = vpop.xlane.xlu2 %929  ;;  %938 = vadd.xlane.f32.xlu1 %v937_v18 }
 0x725   :  { %v932_v3 = vmul.f32 %v930_v21, %v1486_v8 }
 0x727   :  { %v934_v20 = vsub.f32 %v924_v63, %v932_v3 }
 0x729   :  { %v936_v22 = vmul.f32 %v934_v20, %v934_v20  ;;  %v947_v46 = vmul.f32 %v945_v37, %v934_v20 }
 0x72b   :  { %v940_v23 = vsel %vm62_vm0, %v936_v22, 0.0 }
 0x72c   :  { %941 = vadd.xlane.f32.xlu0 %v940_v23 }
 0x797   :  { %v939_v24 = vpop.xlane.xlu1 %938 }
 0x798   :  { %v943_v25 = vmul.f32 %v939_v24, %v1486_v8 }
 0x79a   :  { %v948_v26 = vadd.f32 1e-05, %v943_v25 }
 0x79c   :  { %1095 = vrsqrt.f32 %v948_v26  ;;  %vm956_vm2 = vweird.f32 %v948_v26 }
 0x79f   :  { %v942_v30 = vpop.xlane.xlu0 %941 }
 0x7a0   :  { %v944_v31 = vmul.f32 %v942_v30, %v1486_v8 }
 0x7a2   :  { %v1096_v32 = vpop.eup %1095  ;;  %v949_v33 = vadd.f32 1e-05, %v944_v31 }
 0x7a3   :  { %v951_v27 = vmul.f32 %v1096_v32, %v948_v26  ;;  %vm957_vm15 = vweird.f32 %v1096_v32 }
 0x7a4   :  { %1097 = vrsqrt.f32 %v949_v33  ;;  %vm958_vm3 = vmor %vm956_vm2, %vm957_vm15  ;;  %vm966_vm5 = vweird.f32 %v949_v33 }
 0x7a5   :  { %v952_v34 = vmul.f32 %v1096_v32, %v951_v27 }
 0x7a7   :  { %v953_v36 = vmul.f32 0.5, %v952_v34 }
 0x7a9   :  { %v954_v38 = vsub.f32 1.5, %v953_v36 }
 0x7aa   :  { %v1098_v2 = vpop.eup %1097 }
 0x7ab   :  { %v955_v28 = vmul.f32 %v1096_v32, %v954_v38  ;;  %v961_v39 = vmul.f32 %v1098_v2, %v949_v33  ;;  %vm967_vm4 = vweird.f32 %v1098_v2 }
 0x7ac   :  { %vm968_vm6 = vmor %vm966_vm5, %vm967_vm4 }
 0x7ad   :  { %v959_v35 = vsel %vm958_vm3, %v1096_v32, %v955_v28  ;;  %v962_v8 = vmul.f32 %v1098_v2, %v961_v39 }
 0x7ae   :  { %v970_v41 = vmul.f32 %v959_v35, %v946_v40 }
 0x7af   :  { %v963_v42 = vmul.f32 0.5, %v962_v8 }
 0x7b0   :  { %v973_v43 = vadd.f32 %v972_v29, %v970_v41 }
 0x7b1   :  { %v964_v44 = vsub.f32 1.5, %v963_v42 }
 0x7b2   :  { %975 = vst.msk [vmem:[#allocation7] sm:$0xff] %vm62_vm0, %v973_v43 }
 0x7b3   :  { %v965_v45 = vmul.f32 %v1098_v2, %v964_v44 }
 0x7b5   :  { %v969_v47 = vsel %vm968_vm6, %v1098_v2, %v965_v45 }
 0x7b6   :  { %v971_v6 = vmul.f32 %v969_v47, %v947_v46 }
 0x7b8   :  { %v974_v48 = vadd.f32 %v972_v29, %v971_v6 }
 0x7ba   :  { %976 = vst.msk [vmem:[#allocation7 + $0x8] sm:$0xff] %vm62_vm0, %v974_v48 }
 0x7bb   :  { %989 = dma.vmem_to_hbm [thread:$0]  %s982_s26, 256, %s984_s2, [#allocation4], %s1178_s29, %s1178_s29, %s1179_s30  }
 0x7bc   :  { %1175 = dma.done.wait [#allocation4], 256  }
 0x7bd   :  { %1176 = vsyncadd [#allocation4], 4294967040 }
 0x7be   :  { %994 = vsyncpa [#allocation3], 1 }
 0x7bf   :  { %995 = vsyncpa [#allocation6], 1 }
 0x7c0   :  { %996 = vsyncpa [#allocation4], 1 }

</bundles_post_ra>
